<compile_context>
chip_gen: v7x
topology: tpu7x:2x2x1
jax: 0.10.0
libtpu: 0.0.40
codegen_flags: <defaults>
</compile_context>

<pallas_src>
import jax
import jax.numpy as jnp
from jax.experimental import pallas as pl
from jax.experimental.pallas import tpu as pltpu

H1, H2, OUT = 128, 64, 2
OUT_PAD = 128  # lane-dense padded width for the fc3 output


def mlp_kernel(x_ref, w1_ref, b1_ref, w2_ref, b2_ref, w3_ref, b3_ref, o_ref):
    # Whole hot path (3 matmuls + bias + ReLU) fused; bf16 MXU inputs, f32 acc.
    x = x_ref[...]                                                     # (tb, D) bf16
    h1 = jnp.dot(x, w1_ref[...], preferred_element_type=jnp.float32) + b1_ref[...]
    h1 = jnp.maximum(h1, 0.0).astype(jnp.bfloat16)                     # (tb, 128)
    h2 = jnp.dot(h1, w2_ref[...], preferred_element_type=jnp.float32) + b2_ref[...]
    h2 = jnp.maximum(h2, 0.0).astype(jnp.bfloat16)                     # (tb, 64)
    y = jnp.dot(h2, w3_ref[...], preferred_element_type=jnp.float32) + b3_ref[...]
    o_ref[...] = y.astype(o_ref.dtype)                                 # (tb, 128)


def simple_nn_forward(x, params, *, tb=512):
    """x: (B, input_dim) float32. params: dict of w1,b1,w2,b2,w3,b3 (float32)."""
    B, D = x.shape

    # Batch tile: single grid step for small B, <=512 for large B; multiple of 8.
    tile = min(tb, B)
    tile = max(8, ((tile + 7) // 8) * 8)
    Bp = pl.cdiv(B, tile) * tile
    if Bp != B:
        x = jnp.pad(x, ((0, Bp - B), (0, 0)))

    # bf16 operands for the MXU; biases stay f32 (added post-accumulation).
    xb = x.astype(jnp.bfloat16)
    w1 = params["w1"].astype(jnp.bfloat16)          # (D, 128)
    w2 = params["w2"].astype(jnp.bfloat16)          # (128, 64)
    b1 = params["b1"].astype(jnp.float32)           # (1, 128)
    b2 = params["b2"].astype(jnp.float32)           # (1, 64)
    # Zero-pad fc3 to a lane-dense 128-wide output (exact for first 2 columns).
    w3 = jnp.pad(params["w3"], ((0, 0), (0, OUT_PAD - OUT))).astype(jnp.bfloat16)  # (64, 128)
    b3 = jnp.pad(params["b3"], ((0, 0), (0, OUT_PAD - OUT))).astype(jnp.float32)   # (1, 128)

    grid = (Bp // tile,)
    full = lambda arr: pl.BlockSpec(arr.shape, lambda i: (0, 0))  # resident weights

    flops = 2 * Bp * (D * H1 + H1 * H2 + H2 * OUT_PAD)
    bytes_accessed = (
        Bp * D * 2                                   # x stream (bf16)
        + (D * H1 + H1 * H2 + H2 * OUT_PAD) * 2      # weights (bf16)
        + (H1 + H2 + OUT_PAD) * 4                    # biases (f32)
        + Bp * OUT_PAD * 4                           # output (f32)
    )

    out = pl.pallas_call(
        mlp_kernel,
        out_shape=jax.ShapeDtypeStruct((Bp, OUT_PAD), jnp.float32),
        grid_spec=pl.GridSpec(
            grid=grid,
            in_specs=[
                pl.BlockSpec((tile, D), lambda i: (i, 0)),   # x batch tile
                full(w1), full(b1),
                full(w2), full(b2),
                full(w3), full(b3),
            ],
            out_specs=pl.BlockSpec((tile, OUT_PAD), lambda i: (i, 0)),
        ),
        compiler_params=pltpu.CompilerParams(
            dimension_semantics=("parallel",),       # megacore sharding on v7x
        ),
        cost_estimate=pl.CostEstimate(
            flops=flops, transcendentals=0, bytes_accessed=bytes_accessed
        ),
    )(xb, w1, b1, w2, b2, w3, b3)

    return out[:B, :OUT]


def init_params(key, input_dim):
    """PyTorch-Linear-style uniform init (U[-1/sqrt(fan_in), 1/sqrt(fan_in)])."""
    ks = jax.random.split(key, 6)

    def linear(kw, kb, fan_in, fan_out):
        bound = 1.0 / jnp.sqrt(fan_in)
        w = jax.random.uniform(kw, (fan_in, fan_out), jnp.float32, -bound, bound)
        b = jax.random.uniform(kb, (1, fan_out), jnp.float32, -bound, bound)
        return w, b

    w1, b1 = linear(ks[0], ks[1], input_dim, H1)
    w2, b2 = linear(ks[2], ks[3], H1, H2)
    w3, b3 = linear(ks[4], ks[5], H2, OUT)
    return {"w1": w1, "b1": b1, "w2": w2, "b2": b2, "w3": w3, "b3": b3}


def reference_forward(x, p):
    """Reference using the same bf16-operand / f32-accumulate numerics as the kernel."""
    xb = x.astype(jnp.bfloat16)
    w1 = p["w1"].astype(jnp.bfloat16)
    w2 = p["w2"].astype(jnp.bfloat16)
    w3 = p["w3"].astype(jnp.bfloat16)
    h1 = jnp.maximum(jnp.dot(xb, w1, preferred_element_type=jnp.float32) + p["b1"], 0.0)
    h1 = h1.astype(jnp.bfloat16)
    h2 = jnp.maximum(jnp.dot(h1, w2, preferred_element_type=jnp.float32) + p["b2"], 0.0)
    h2 = h2.astype(jnp.bfloat16)
    return jnp.dot(h2, w3, preferred_element_type=jnp.float32) + p["b3"]


if __name__ == "__main__":
    key = jax.random.PRNGKey(0)
    k_x, k_p = jax.random.split(key)

    batch, input_dim = 64, 32
    x = jax.random.normal(k_x, (batch, input_dim), jnp.float32)
    params = init_params(k_p, input_dim)

    out = simple_nn_forward(x, params)          # tile -> 64, single grid step
    out = jax.block_until_ready(out)

    ref = reference_forward(x, params)
    assert out.shape == (batch, OUT)
    assert jnp.allclose(out, ref, atol=2e-3, rtol=2e-3), "mismatch vs. JAX reference"

    print("KERNEL_OK")
</pallas_src>

<mosaic_0001>
module attributes {stable_mosaic.version = 11 : i64} {
  func.func @mlp_kernel(%arg0: i32, %arg1: memref<64x32xbf16, #tpu.memory_space<vmem>>, %arg2: memref<32x128xbf16, #tpu.memory_space<vmem>>, %arg3: memref<1x128xf32, #tpu.memory_space<vmem>>, %arg4: memref<128x64xbf16, #tpu.memory_space<vmem>>, %arg5: memref<1x64xf32, #tpu.memory_space<vmem>>, %arg6: memref<64x128xbf16, #tpu.memory_space<vmem>>, %arg7: memref<1x128xf32, #tpu.memory_space<vmem>>, %arg8: memref<64x128xf32, #tpu.memory_space<vmem>>) attributes {dimension_semantics = [#tpu.dimension_semantics<parallel>], iteration_bounds = array<i64: 1>, scalar_prefetch = 0 : i64, scratch_operands = 0 : i64, tpu.core_type = #tpu.core_type<tc>, window_params = [{transform_indices = @transform_0, window_bounds = array<i64: 64, 32>}, {pipeline_mode = #tpu.pipeline_mode<synchronous>, transform_indices = @transform_1, window_bounds = array<i64: 32, 128>}, {pipeline_mode = #tpu.pipeline_mode<synchronous>, transform_indices = @transform_2, window_bounds = array<i64: 1, 128>}, {pipeline_mode = #tpu.pipeline_mode<synchronous>, transform_indices = @transform_3, window_bounds = array<i64: 128, 64>}, {pipeline_mode = #tpu.pipeline_mode<synchronous>, transform_indices = @transform_4, window_bounds = array<i64: 1, 64>}, {pipeline_mode = #tpu.pipeline_mode<synchronous>, transform_indices = @transform_5, window_bounds = array<i64: 64, 128>}, {pipeline_mode = #tpu.pipeline_mode<synchronous>, transform_indices = @transform_6, window_bounds = array<i64: 1, 128>}, {transform_indices = @transform_7, window_bounds = array<i64: 64, 128>}]} {
    %c0 = arith.constant 0 : index
    %c0_0 = arith.constant 0 : index
    %0 = vector.load %arg1[%c0, %c0_0] : memref<64x32xbf16, #tpu.memory_space<vmem>>, vector<64x32xbf16>
    %c0_1 = arith.constant 0 : index
    %c0_2 = arith.constant 0 : index
    %1 = vector.load %arg2[%c0_1, %c0_2] : memref<32x128xbf16, #tpu.memory_space<vmem>>, vector<32x128xbf16>
    %cst = arith.constant dense<0.000000e+00> : vector<64x128xf32>
    %2 = tpu.matmul %0, %1, %cst {dimension_numbers = #tpu.dot_dimension_numbers<[1], [0], [0], [1], [0, 0, 1, 1], [], []>} : vector<64x32xbf16>, vector<32x128xbf16>, vector<64x128xf32> -> vector<64x128xf32>
    %c0_3 = arith.constant 0 : index
    %c0_4 = arith.constant 0 : index
    %3 = vector.load %arg3[%c0_3, %c0_4] : memref<1x128xf32, #tpu.memory_space<vmem>>, vector<1x128xf32>
    %4 = vector.broadcast %3 : vector<1x128xf32> to vector<64x128xf32>
    %5 = arith.addf %2, %4 : vector<64x128xf32>
    %cst_5 = arith.constant 0.000000e+00 : f32
    %6 = vector.broadcast %cst_5 : f32 to vector<64x128xf32>
    %7 = arith.maximumf %5, %6 : vector<64x128xf32>
    %8 = arith.truncf %7 : vector<64x128xf32> to vector<64x128xbf16>
    %c0_6 = arith.constant 0 : index
    %c0_7 = arith.constant 0 : index
    %9 = vector.load %arg4[%c0_6, %c0_7] : memref<128x64xbf16, #tpu.memory_space<vmem>>, vector<128x64xbf16>
    %cst_8 = arith.constant dense<0.000000e+00> : vector<64x64xf32>
    %10 = tpu.matmul %8, %9, %cst_8 {dimension_numbers = #tpu.dot_dimension_numbers<[1], [0], [0], [1], [0, 0, 1, 1], [], []>} : vector<64x128xbf16>, vector<128x64xbf16>, vector<64x64xf32> -> vector<64x64xf32>
    %c0_9 = arith.constant 0 : index
    %c0_10 = arith.constant 0 : index
    %11 = vector.load %arg5[%c0_9, %c0_10] : memref<1x64xf32, #tpu.memory_space<vmem>>, vector<1x64xf32>
    %12 = vector.broadcast %11 : vector<1x64xf32> to vector<64x64xf32>
    %13 = arith.addf %10, %12 : vector<64x64xf32>
    %cst_11 = arith.constant 0.000000e+00 : f32
    %14 = vector.broadcast %cst_11 : f32 to vector<64x64xf32>
    %15 = arith.maximumf %13, %14 : vector<64x64xf32>
    %16 = arith.truncf %15 : vector<64x64xf32> to vector<64x64xbf16>
    %c0_12 = arith.constant 0 : index
    %c0_13 = arith.constant 0 : index
    %17 = vector.load %arg6[%c0_12, %c0_13] : memref<64x128xbf16, #tpu.memory_space<vmem>>, vector<64x128xbf16>
    %cst_14 = arith.constant dense<0.000000e+00> : vector<64x128xf32>
    %18 = tpu.matmul %16, %17, %cst_14 {dimension_numbers = #tpu.dot_dimension_numbers<[1], [0], [0], [1], [0, 0, 1, 1], [], []>} : vector<64x64xbf16>, vector<64x128xbf16>, vector<64x128xf32> -> vector<64x128xf32>
    %c0_15 = arith.constant 0 : index
    %c0_16 = arith.constant 0 : index
    %19 = vector.load %arg7[%c0_15, %c0_16] : memref<1x128xf32, #tpu.memory_space<vmem>>, vector<1x128xf32>
    %20 = vector.broadcast %19 : vector<1x128xf32> to vector<64x128xf32>
    %21 = arith.addf %18, %20 : vector<64x128xf32>
    %c0_17 = arith.constant 0 : index
    %c0_18 = arith.constant 0 : index
    %22 = vector.load %arg8[%c0_17, %c0_18] : memref<64x128xf32, #tpu.memory_space<vmem>>, vector<64x128xf32>
    tpu.vector_store %arg8[%c0_17, %c0_18], %21 {strides = array<i32>} : memref<64x128xf32, #tpu.memory_space<vmem>>, vector<64x128xf32>,
    return
  }
  func.func @transform_0(%arg0: i32) -> (i32, i32) {
    %c0_i32 = arith.constant 0 : i32
    %c0_i32_0 = arith.constant 0 : i32
    return %arg0, %c0_i32 : i32, i32
  }
  func.func @transform_1(%arg0: i32) -> (i32, i32) {
    %c0_i32 = arith.constant 0 : i32
    %c0_i32_0 = arith.constant 0 : i32
    %c0_i32_1 = arith.constant 0 : i32
    return %c0_i32, %c0_i32_0 : i32, i32
  }
  func.func @transform_2(%arg0: i32) -> (i32, i32) {
    %c0_i32 = arith.constant 0 : i32
    %c0_i32_0 = arith.constant 0 : i32
    %c0_i32_1 = arith.constant 0 : i32
    return %c0_i32, %c0_i32_0 : i32, i32
  }
  func.func @transform_3(%arg0: i32) -> (i32, i32) {
    %c0_i32 = arith.constant 0 : i32
    %c0_i32_0 = arith.constant 0 : i32
    %c0_i32_1 = arith.constant 0 : i32
    return %c0_i32, %c0_i32_0 : i32, i32
  }
  func.func @transform_4(%arg0: i32) -> (i32, i32) {
    %c0_i32 = arith.constant 0 : i32
    %c0_i32_0 = arith.constant 0 : i32
    %c0_i32_1 = arith.constant 0 : i32
    return %c0_i32, %c0_i32_0 : i32, i32
  }
  func.func @transform_5(%arg0: i32) -> (i32, i32) {
    %c0_i32 = arith.constant 0 : i32
    %c0_i32_0 = arith.constant 0 : i32
    %c0_i32_1 = arith.constant 0 : i32
    return %c0_i32, %c0_i32_0 : i32, i32
  }
  func.func @transform_6(%arg0: i32) -> (i32, i32) {
    %c0_i32 = arith.constant 0 : i32
    %c0_i32_0 = arith.constant 0 : i32
    %c0_i32_1 = arith.constant 0 : i32
    return %c0_i32, %c0_i32_0 : i32, i32
  }
  func.func @transform_7(%arg0: i32) -> (i32, i32) {
    %c0_i32 = arith.constant 0 : i32
    %c0_i32_0 = arith.constant 0 : i32
    return %arg0, %c0_i32 : i32, i32
  }
}

</mosaic_0001>

<bundles_post_ra>
// kernel: tpu_custom_call.1
= control target key start
LH: loop header
LB: loop body
LE: loop exit
PB: predicated region body
PF: predicated region fallthrough
CT: control target
= control target key end

     0   :  { %vm79_vm0 = vcmask 261120   ;;  %s736_s0 = inlined_call_operand.vmem [shape: bf16[64,32], index: 0, kind: input, shape index: {}]   ;;  %s737_s1 = inlined_call_operand.vmem [shape: bf16[32,128], index: 1, kind: input, shape index: {}]   ;;  %s738_s2 = inlined_call_operand.vmem [shape: f32[1,128], index: 2, kind: input, shape index: {}]   ;;  %s739_s3 = inlined_call_operand.vmem [shape: bf16[128,64], index: 3, kind: input, shape index: {}]   ;;  %s740_s4 = inlined_call_operand.vmem [shape: f32[1,64], index: 4, kind: input, shape index: {}]   ;;  %s741_s5 = inlined_call_operand.vmem [shape: bf16[64,128], index: 5, kind: input, shape index: {}]   ;;  %s742_s6 = inlined_call_operand.vmem [shape: f32[1,128], index: 6, kind: input, shape index: {}]   ;;  %s743_s7 = inlined_call_operand.hbm [shape: f32[64,128], index: 7, kind: output, shape index: {}]  }
   0x1   :  { %v568_v0 = vld [vmem:[%s737_s1] sm:$0xff]   ;;  %v569_v1 = vld [vmem:[%s737_s1 + $0x8] sm:$0xff]   ;;  %v572_v4 = vld [vmem:[%s736_s0 + $0x10] sm:$0xff]  }
   0x2   :  { %513 = vmatprep.subr.bf16.mxu0 %v568_v0  ;;  %v570_v2 = vld [vmem:[%s736_s0] sm:$0xff]   ;;  %v571_v3 = vld [vmem:[%s736_s0 + $0x8] sm:$0xff]   ;;  %v576_v7 = vld [vmem:[%s739_s3 + $0x10] sm:$0xff]  }
   0x3   :  { %514 = vmatpush3.bf16.msra.mxu0 %v568_v0  ;;  %517 = vmatprep.mubr.msk.bf16.mxu0 %vm79_vm0, %v570_v2  ;;  %v574_v5 = vld [vmem:[%s739_s3] sm:$0xff]   ;;  %v575_v6 = vld [vmem:[%s739_s3 + $0x8] sm:$0xff]   ;;  %v573_v8 = vld [vmem:[%s736_s0 + $0x18] sm:$0xff]  }
   0x4   :  { %515 = vmatprep.subr.bf16.mxu0 %v569_v1  ;;  %525 = vmatprep.subr.bf16.mxu1 %v574_v5  ;;  %v577_v9 = vld [vmem:[%s739_s3 + $0x18] sm:$0xff]  }
   0x5   :  { %526 = vmatpush3.bf16.msra.mxu1 %v574_v5 }
   0x6   :  { %527 = vmatprep.subr.bf16.mxu1 %v575_v6 }
   0x7   :  { %516 = vmatpush3.bf16.msra.mxu0 %v569_v1 }
   0x9   :  { %528 = vmatpush3.bf16.msra.mxu1 %v575_v6 }
   0xa   :  { %518 = vmatmul.mubr.msk.bf16.vlgmr.msra.gmra.mrb[0].mxu0 %vm79_vm0, %v571_v3  ;;  %529 = vmatprep.subr.bf16.mxu1 %v576_v7 }
   0xb   :  { %521 = vmatprep.mubr.msk.bf16.mxu0 %vm79_vm0, %v572_v4 }
   0xc   :  { %12 = vsyncpa [#allocation3], 0  ;;  %v578_v10 = vld [vmem:[%s739_s3 + $0x20] sm:$0xff]   ;;  %v579_v11 = vld [vmem:[%s739_s3 + $0x28] sm:$0xff]   ;;  %vm356_vm1 = vcmask 523264   ;;  %s610_s13 = smov [#allocation2]  }
   0xd   :  { %530 = vmatpush3.bf16.msra.mxu1 %v576_v7  ;;  %v580_v12 = vld [vmem:[%s739_s3 + $0x30] sm:$0xff]   ;;  %v581_v13 = vld [vmem:[%s739_s3 + $0x38] sm:$0xff]   ;;  %v582_v14 = vld [vmem:[%s741_s5] sm:$0xff]   ;;  %s447_s14 = sshll.u32 %s610_s13, 4  ;;  %s448_s14 = int_to_ptr.vmem [resolvable:$true] %s447_s14 }
   0xe   :  { %531 = vmatprep.subr.bf16.mxu1 %v577_v9  ;;  %v583_v15 = vld [vmem:[%s741_s5 + $0x8] sm:$0xff]   ;;  %549 = vmatprep.subr.bf16.mxu0 %v582_v14  ;;  %v458_v16 = vld [vmem:[%s738_s2] ss:$0 sm:$0xff]  ;;  %v584_v45 = vld [vmem:[%s741_s5 + $0x10] sm:$0xff]   ;;  %p591_p1 = scmp.lt.s32.totalorder %s448_s14, %s448_s14 }
   0xf   :  { %550 = vmatpush3.bf16.msra.mxu0 %v582_v14  ;;  %v585_v46 = vld [vmem:[%s741_s5 + $0x18] sm:$0xff]   ;;  %v469_v47 = vld [vmem:[%s740_s4] ss:$0 sm:$0xff] }
  0x10   :  { %551 = vmatprep.subr.bf16.mxu0 %v583_v15 }
  0x11   :  { %532 = vmatpush3.bf16.msra.mxu1 %v577_v9 }
  0x12   :  { %522 = vmatmul.mubr.msk.bf16.gmra.mrb[4].mxu0 %vm79_vm0, %v573_v8  ;;  %533 = vmatprep.subr.bf16.mxu1 %v578_v10 }
  0x13   :  { %552 = vmatpush3.bf16.msra.mxu0 %v583_v15 }
  0x14   :  { %553 = vmatprep.subr.bf16.mxu0 %v584_v45 }
  0x15   :  { %534 = vmatpush3.bf16.msra.mxu1 %v578_v10 }
  0x16   :  { %535 = vmatprep.subr.bf16.mxu1 %v579_v11 }
  0x17   :  { %554 = vmatpush3.bf16.msra.mxu0 %v584_v45 }
  0x18   :  { %555 = vmatprep.subr.bf16.mxu0 %v585_v46 }
  0x19   :  { %536 = vmatpush3.bf16.msra.mxu1 %v579_v11 }
  0x1a   :  { %537 = vmatprep.subr.bf16.mxu1 %v580_v12 }
  0x1b   :  { %556 = vmatpush3.bf16.msra.mxu0 %v585_v46 }
  0x1d   :  { %538 = vmatpush3.bf16.msra.mxu1 %v580_v12  ;;  %v478_v12 = vld [vmem:[%s742_s6] ss:$0 sm:$0xff]  ;;  %s586_s6 = scalar_lea.vmem %s448_s14, 1024 }
  0x1e   :  { %539 = vmatprep.subr.bf16.mxu1 %v581_v13  ;;  %p587_p0 = scmp.ne.s32.totalorder %s448_s14, %s586_s6  ;;  %p592_p2 = scmp.lt.s32.totalorder %s586_s6, %s586_s6 }
  0x20   :  { %p593_p3 = por %p592_p2, %p591_p1 }
  0x21   :  { %540 = vmatpush3.bf16.msra.mxu1 %v581_v13 }
  0x22   :  { %p594_p4 = pnand %p593_p3, %p587_p0 }
  0xdd   :  { %v519_v17 = vpop.f32.mrb[0].mxu0 }
  0xde   :  { %v135_v18 = vadd.f32 %v519_v17, %v458_v16  ;;  %v126_v19 = vpop.f32.mrb[1].mxu0 }
  0xdf   :  { %v127_v20 = vadd.f32 %v458_v16, %v126_v19  ;;  %v520_v21 = vpop.f32.mrb[2].mxu0 }
  0xe0   :  { %v138_v22 = vadd.f32 %v520_v21, %v458_v16  ;;  %v129_v23 = vpop.f32.mrb[3].mxu0  ;;  %v159_v25 = vmax.f32 %v135_v18, 0.0 }
  0xe1   :  { %v130_v24 = vadd.f32 %v458_v16, %v129_v23  ;;  %v157_v27 = vmax.f32 %v127_v20, 0.0 }
  0xe2   :  { %v160_v26 = vmax.f32 %v138_v22, 0.0 }
  0xe3   :  { %v158_v28 = vmax.f32 %v130_v24, 0.0 }
  0xe4   :  { %v166_v29 = vpack.c.bf16 %v160_v26, %v159_v25 }
  0xe5   :  { %v523_v30 = vpop.f32.mrb[4].mxu0  ;;  %v165_v31 = vpack.c.bf16 %v158_v28, %v157_v27 }
  0xe6   :  { %v151_v32 = vadd.f32 %v523_v30, %v458_v16  ;;  %v142_v33 = vpop.f32.mrb[5].mxu0 }
  0xe7   :  { %v143_v34 = vadd.f32 %v458_v16, %v142_v33  ;;  %v524_v35 = vpop.f32.mrb[6].mxu0  ;;  %541 = vmatprep.mubr.bf16.mxu1 %v165_v31 }
  0xe8   :  { %v154_v36 = vadd.f32 %v524_v35, %v458_v16  ;;  %v145_v37 = vpop.f32.mrb[7].mxu0  ;;  %542 = vmatmul.mubr.bf16.vlgmr.msra.gmra.mrb[0].mxu1 %v166_v29  ;;  %v163_v39 = vmax.f32 %v151_v32, 0.0 }
  0xe9   :  { %v146_v38 = vadd.f32 %v458_v16, %v145_v37  ;;  %v161_v41 = vmax.f32 %v143_v34, 0.0 }
  0xea   :  { %v164_v40 = vmax.f32 %v154_v36, 0.0 }
  0xeb   :  { %v162_v42 = vmax.f32 %v146_v38, 0.0 }
  0xec   :  { %v168_v43 = vpack.c.bf16 %v164_v40, %v163_v39 }
  0xed   :  { %v167_v44 = vpack.c.bf16 %v162_v42, %v161_v41 }
  0xef   :  { %545 = vmatprep.mubr.bf16.mxu1 %v167_v44 }
  0xf0   :  { %546 = vmatmul.mubr.bf16.gmra.mrb[4].mxu1 %v168_v43 }
 0x1bb   :  { %v543_v48 = vpop.f32.mrb[0].mxu1 }
 0x1bc   :  { %v283_v49 = vadd.f32 %v543_v48, %v469_v47  ;;  %v274_v50 = vpop.f32.mrb[1].mxu1 }
 0x1bd   :  { %v275_v51 = vadd.f32 %v469_v47, %v274_v50  ;;  %v544_v52 = vpop.f32.mrb[2].mxu1 }
 0x1be   :  { %v286_v53 = vadd.f32 %v544_v52, %v469_v47  ;;  %v277_v54 = vpop.f32.mrb[3].mxu1  ;;  %v307_v56 = vmax.f32 %v283_v49, 0.0 }
 0x1bf   :  { %v278_v55 = vadd.f32 %v469_v47, %v277_v54  ;;  %v305_v58 = vmax.f32 %v275_v51, 0.0 }
 0x1c0   :  { %v308_v57 = vmax.f32 %v286_v53, 0.0 }
 0x1c1   :  { %v306_v59 = vmax.f32 %v278_v55, 0.0 }
 0x1c2   :  { %v314_v60 = vpack.c.bf16 %v308_v57, %v307_v56 }
 0x1c3   :  { %v313_v61 = vpack.c.bf16 %v306_v59, %v305_v58  ;;  %v547_v62 = vpop.f32.mrb[4].mxu1 }
 0x1c4   :  { %v299_v63 = vadd.f32 %v547_v62, %v469_v47  ;;  %v290_v0 = vpop.f32.mrb[5].mxu1 }
 0x1c5   :  { %v291_v1 = vadd.f32 %v469_v47, %v290_v0  ;;  %v548_v2 = vpop.f32.mrb[6].mxu1  ;;  %557 = vmatprep.mubr.msk.bf16.mxu0 %vm356_vm1, %v313_v61 }
 0x1c6   :  { %v302_v3 = vadd.f32 %v548_v2, %v469_v47  ;;  %v293_v4 = vpop.f32.mrb[7].mxu1  ;;  %558 = vmatmul.mubr.msk.bf16.vlgmr.msra.gmra.mrb[8].mxu0 %vm356_vm1, %v314_v60  ;;  %v311_v6 = vmax.f32 %v299_v63, 0.0 }
 0x1c7   :  { %v294_v5 = vadd.f32 %v469_v47, %v293_v4  ;;  %v309_v8 = vmax.f32 %v291_v1, 0.0 }
 0x1c8   :  { %v312_v7 = vmax.f32 %v302_v3, 0.0 }
 0x1c9   :  { %v310_v9 = vmax.f32 %v294_v5, 0.0 }
 0x1ca   :  { %v316_v10 = vpack.c.bf16 %v312_v7, %v311_v6 }
 0x1cb   :  { %v315_v11 = vpack.c.bf16 %v310_v9, %v309_v8 }
 0x1cd   :  { %561 = vmatprep.mubr.msk.bf16.mxu0 %vm356_vm1, %v315_v11 }
 0x1ce   :  { %562 = vmatmul.mubr.msk.bf16.gmra.mrb[12].mxu0 %vm356_vm1, %v316_v10 }
 0x299   :  { %v559_v13 = vpop.f32.mrb[8].mxu0 }
 0x29a   :  { %v412_v14 = vadd.f32 %v559_v13, %v478_v12  ;;  %v403_v15 = vpop.f32.mrb[9].mxu0 }
 0x29b   :  { %v404_v16 = vadd.f32 %v478_v12, %v403_v15  ;;  %v560_v17 = vpop.f32.mrb[10].mxu0 }
 0x29c   :  { %436 = vst [vmem:[#allocation2 + $0x10] sm:$0xff] %v412_v14  ;;  %v415_v18 = vadd.f32 %v560_v17, %v478_v12  ;;  %v406_v19 = vpop.f32.mrb[11].mxu0 }
 0x29d   :  { %434 = vst [vmem:[#allocation2] sm:$0xff] %v404_v16  ;;  %v407_v20 = vadd.f32 %v478_v12, %v406_v19 }
 0x29e   :  { %437 = vst [vmem:[#allocation2 + $0x18] sm:$0xff] %v415_v18 }
 0x29f   :  { %435 = vst [vmem:[#allocation2 + $0x8] sm:$0xff] %v407_v20 }
 0x2a1   :  { %v563_v21 = vpop.f32.mrb[12].mxu0 }
 0x2a2   :  { %v428_v22 = vadd.f32 %v563_v21, %v478_v12  ;;  %v419_v23 = vpop.f32.mrb[13].mxu0 }
 0x2a3   :  { %v420_v24 = vadd.f32 %v478_v12, %v419_v23  ;;  %v564_v25 = vpop.f32.mrb[14].mxu0 }
 0x2a4   :  { %440 = vst [vmem:[#allocation2 + $0x30] sm:$0xff] %v428_v22  ;;  %v431_v26 = vadd.f32 %v564_v25, %v478_v12  ;;  %v422_v27 = vpop.f32.mrb[15].mxu0 }
 0x2a5   :  { %438 = vst [vmem:[#allocation2 + $0x20] sm:$0xff] %v420_v24  ;;  %v423_v28 = vadd.f32 %v478_v12, %v422_v27 }
 0x2a6   :  { %441 = vst [vmem:[#allocation2 + $0x38] sm:$0xff] %v431_v26 }
 0x2a7   :  { %439 = vst [vmem:[#allocation2 + $0x28] sm:$0xff] %v423_v28 }
 0x2a8   :  { %597 = shalt.err (!%p594_p4)
}
 0x2a9   :  { %s598_s17 = scalar_lea.hbm %s743_s7, 1024 }
 0x2aa   :  { %p599_p5 = scmp.ne.s32.totalorder %s743_s7, %s598_s17  ;;  %p602_p6 = scmp.lt.u32.totalorder %s598_s17, %s743_s7 }
 0x2ac   :  { %p604_p7 = pnand %p602_p6, %p599_p5 }
 0x2ae   :  { %607 = shalt.err (!%p604_p7)
}
 0x2af   :  { %s611_s22 = smov 128   ;;  %s612_s23 = smov 8  }
 0x2b0   :  { %453 = dma.vmem_to_hbm [thread:$0]  %s448_s14, 1024, %s743_s7, [#allocation3], %s611_s22, %s611_s22, %s612_s23  }
 0x2b1   :  { %608 = dma.done.wait [#allocation3], 1024  }
 0x2b2   :  { %609 = vsyncadd [#allocation3], 4294966272 }
 0x2b3   :  { %457 = vsyncpa [#allocation3], 1 }

</bundles_post_ra>
